<compile_context>
chip_gen: v6e
topology: v6e:2x2x1
jax: 0.10.0
libtpu: 0.0.40
codegen_flags: <defaults>
</compile_context>

<pallas_src>
import functools
import math

import jax
import jax.numpy as jnp
from jax.experimental import pallas as pl
from jax.experimental.pallas import tpu as pltpu


# ---------------------------------------------------------------------------
# Kernel
# ---------------------------------------------------------------------------
def _focal_kernel(pred_ref, gt_ref, loss_out, npos_out, loss_acc, npos_acc,
                  *, tile_rows, acc_rows, valid_rows, tiles_per_core,
                  need_row_mask):
    t = pl.program_id(1)

    @pl.when(t == 0)
    def _init():
        loss_acc[...] = jnp.zeros_like(loss_acc)
        npos_acc[...] = jnp.zeros_like(npos_acc)

    p = pred_ref[...].astype(jnp.float32)
    g = gt_ref[...].astype(jnp.float32)

    pos = g == 1.0
    neg = g < 1.0

    omp = 1.0 - p
    omg = 1.0 - g
    omg2 = omg * omg
    neg_w = omg2 * omg2                      # (1 - gt)^4, VALU only

    # One log per element (EUP has a single slot).  The nested where keeps
    # padded / masked elements (gt = 2.0, pred = 0.5) at exactly zero and the
    # log argument finite; NaNs on a gated-off branch never survive a where.
    x = jnp.where(pos, p, omp)
    logx = jnp.log(x)
    coeff = jnp.where(pos, omp * omp, jnp.where(neg, p * p * neg_w, 0.0))
    contrib = logx * coeff
    pos_f = pos.astype(jnp.float32)

    if need_row_mask:
        # The last block may be partial (rows past `valid_rows` hold
        # unspecified data) -> zero their contribution and their pos count.
        c = pl.program_id(0)
        row0 = (c * tiles_per_core + t) * tile_rows
        rid = row0 + jax.lax.broadcasted_iota(jnp.int32, (tile_rows, 1), 0)
        valid = rid < valid_rows
        contrib = jnp.where(valid, contrib, 0.0)
        pos_f = jnp.where(valid, pos_f, 0.0)

    if tile_rows == acc_rows:
        loss_acc[...] += contrib
        npos_acc[...] += pos_f
    else:
        # Leading-axis reduce = pure VPU vreg adds (no XLU), so the resident
        # accumulator stays (8, lanes) and contributes ~no VMEM traffic.
        n = tile_rows // acc_rows
        loss_acc[...] += contrib.reshape(n, acc_rows, -1).sum(axis=0)
        npos_acc[...] += pos_f.reshape(n, acc_rows, -1).sum(axis=0)

    @pl.when(t == pl.num_programs(1) - 1)
    def _finalize():
        loss_out[...] = jnp.sum(loss_acc[...]).reshape(1, 1, 1)
        npos_out[...] = jnp.sum(npos_acc[...]).reshape(1, 1, 1)


# ---------------------------------------------------------------------------
# Wrapper
# ---------------------------------------------------------------------------
def _default_num_cores():
    # 1 TensorCore/chip on v5e/v6e; 2 on v7x (megacore).
    try:
        kind = jax.devices()[0].device_kind.lower()
    except Exception:
        return 1
    return 2 if "v7" in kind else 1


def _choose_lanes(total):
    for lw in (512, 256, 128):
        if total % lw == 0:
            return lw, 0
    lw = 128
    return lw, (-total) % lw


def focal_loss_pallas(pred, gt, *, max_tile_rows=1024, num_cores=None):
    """Forward of FocalLoss: pred (B,C,H,W) probabilities, gt (B,C,H,W)."""
    assert pred.shape == gt.shape
    total = math.prod(pred.shape)
    cdiv = lambda a, b: -(-a // b)

    if num_cores is None:
        num_cores = _default_num_cores()

    lw, pad = _choose_lanes(total)
    p_flat = pred.reshape(-1)                 # native dtype; cast in-kernel
    g_flat = gt.reshape(-1)
    if pad:
        # Rare fallback (total not a multiple of 128): pad <=127 elements with
        # gt=2.0 / pred=0.5 so they contribute exactly zero.  Costs one copy.
        p_flat = jnp.concatenate(
            [p_flat, jnp.full((pad,), 0.5, p_flat.dtype)])
        g_flat = jnp.concatenate(
            [g_flat, jnp.full((pad,), 2.0, g_flat.dtype)])
    rows = (total + pad) // lw
    p2 = p_flat.reshape(rows, lw)
    g2 = g_flat.reshape(rows, lw)

    # Minimum sublane granule depends on dtype (f32: 8, bf16: 16, 8-bit: 32).
    itemsize = min(p2.dtype.itemsize, g2.dtype.itemsize)
    granule = {4: 8, 2: 16, 1: 32}.get(itemsize, 8)

    if rows <= max_tile_rows:
        tile_rows = rows                      # full-extent block (always legal)
    else:
        tile_rows = max(granule, (max_tile_rows // granule) * granule)

    total_tiles = cdiv(rows, tile_rows)
    num_cores = max(1, min(num_cores, total_tiles))
    tiles_per_core = cdiv(total_tiles, num_cores)

    need_row_mask = (num_cores * tiles_per_core * tile_rows != rows)
    acc_rows = 8 if tile_rows % 8 == 0 else tile_rows
    last_block = total_tiles - 1

    if num_cores * tiles_per_core > total_tiles:
        # Phantom tiles (fully masked) re-read the last real block.
        in_map = lambda c, t: (jnp.minimum(c * tiles_per_core + t, last_block), 0)
    else:
        in_map = lambda c, t: (c * tiles_per_core + t, 0)
    out_map = lambda c, t: (c, 0, 0)

    kernel = functools.partial(
        _focal_kernel, tile_rows=tile_rows, acc_rows=acc_rows,
        valid_rows=rows, tiles_per_core=tiles_per_core,
        need_row_mask=need_row_mask)

    loss_parts, npos_parts = pl.pallas_call(
        kernel,
        out_shape=(jax.ShapeDtypeStruct((num_cores, 1, 1), jnp.float32),) * 2,
        grid_spec=pltpu.PrefetchScalarGridSpec(
            num_scalar_prefetch=0,
            grid=(num_cores, tiles_per_core),
            in_specs=[pl.BlockSpec((tile_rows, lw), in_map),
                      pl.BlockSpec((tile_rows, lw), in_map)],
            out_specs=(pl.BlockSpec((1, 1, 1), out_map),) * 2,
            scratch_shapes=[pltpu.VMEM((acc_rows, lw), jnp.float32)] * 2,
        ),
        compiler_params=pltpu.CompilerParams(
            dimension_semantics=("parallel", "arbitrary")),
    )(p2, g2)

    loss_sum = jnp.sum(loss_parts)
    num_pos = jnp.sum(npos_parts)
    denom = jnp.where(num_pos == 0, 1.0, num_pos)
    # num_pos == 0  =>  positive part is exactly 0, so -loss_sum == -neg_loss.
    return jnp.where(num_pos == 0, -loss_sum, -loss_sum / denom)


# ---------------------------------------------------------------------------
# Pure-JAX reference (mirrors the PyTorch _neg_loss)
# ---------------------------------------------------------------------------
def _ref_neg_loss(pred, gt):
    pred = pred.astype(jnp.float32)
    gt = gt.astype(jnp.float32)
    pos_inds = (gt == 1.0).astype(jnp.float32)
    neg_inds = (gt < 1.0).astype(jnp.float32)
    neg_weights = (1.0 - gt) ** 4
    pos_loss = jnp.sum(jnp.log(pred) * (1.0 - pred) ** 2 * pos_inds)
    neg_loss = jnp.sum(jnp.log(1.0 - pred) * pred ** 2 * neg_weights * neg_inds)
    num_pos = jnp.sum(pos_inds)
    return jnp.where(num_pos == 0, -neg_loss,
                     -(pos_loss + neg_loss) /
                     jnp.where(num_pos == 0, 1.0, num_pos))


if __name__ == "__main__":
    key = jax.random.PRNGKey(0)
    B, C, H, W = 2, 4, 16, 16
    k1, k2, k3 = jax.random.split(key, 3)

    # pred are probabilities (module is applied after sigmoid upstream)
    pred = jax.random.uniform(k1, (B, C, H, W), jnp.float32, 0.01, 0.99)
    gt = jax.random.uniform(k2, (B, C, H, W), jnp.float32, 0.0, 0.999)
    gt = gt.at[:, :, ::8, ::8].set(1.0)          # a few exact-1.0 peaks

    out = jax.block_until_ready(focal_loss_pallas(pred, gt))
    ref = _ref_neg_loss(pred, gt)
    assert jnp.allclose(out, ref, rtol=1e-4, atol=1e-4), (out, ref)

    # num_pos == 0 branch
    gt0 = jnp.clip(gt, 0.0, 0.999)
    out0 = jax.block_until_ready(focal_loss_pallas(pred, gt0))
    ref0 = _ref_neg_loss(pred, gt0)
    assert jnp.allclose(out0, ref0, rtol=1e-4, atol=1e-4), (out0, ref0)

    # multi-tile path (forces accumulation across inner grid steps)
    B2, C2, H2, W2 = 2, 4, 64, 64
    k4, k5, k6 = jax.random.split(k3, 3)
    pred2 = jax.random.uniform(k4, (B2, C2, H2, W2), jnp.float32, 0.01, 0.99)
    gt2 = jax.random.uniform(k5, (B2, C2, H2, W2), jnp.float32, 0.0, 0.999)
    gt2 = gt2.at[:, :, ::16, ::16].set(1.0)
    out2 = jax.block_until_ready(focal_loss_pallas(pred2, gt2, max_tile_rows=8))
    ref2 = _ref_neg_loss(pred2, gt2)
    assert jnp.allclose(out2, ref2, rtol=1e-4, atol=1e-4), (out2, ref2)

    # ragged-rows path: rows not divisible by tile_rows -> in-kernel iota mask
    k7, k8 = jax.random.split(k6, 2)
    pred3 = jax.random.uniform(k7, (3, 4, 40, 32), jnp.float32, 0.01, 0.99)
    gt3 = jax.random.uniform(k8, (3, 4, 40, 32), jnp.float32, 0.0, 0.999)
    gt3 = gt3.at[:, :, ::10, ::8].set(1.0)
    out3 = jax.block_until_ready(focal_loss_pallas(pred3, gt3, max_tile_rows=8))
    ref3 = _ref_neg_loss(pred3, gt3)
    assert jnp.allclose(out3, ref3, rtol=1e-4, atol=1e-4), (out3, ref3)

    # tiny odd shape: exercises the (rare) lane-pad fallback
    pred4 = jax.random.uniform(k1, (2, 3, 5, 7), jnp.float32, 0.01, 0.99)
    gt4 = jax.random.uniform(k2, (2, 3, 5, 7), jnp.float32, 0.0, 0.999)
    gt4 = gt4.at[:, :, 0, 0].set(1.0)
    out4 = jax.block_until_ready(focal_loss_pallas(pred4, gt4))
    ref4 = _ref_neg_loss(pred4, gt4)
    assert jnp.allclose(out4, ref4, rtol=1e-4, atol=1e-4), (out4, ref4)

    # bf16 inputs: fed to the kernel in bf16 (half the HBM bytes), cast
    # to f32 inside; reference uses the same quantized values.
    pred_bf = pred.astype(jnp.bfloat16)
    gt_bf = gt.astype(jnp.bfloat16)
    out5 = jax.block_until_ready(focal_loss_pallas(pred_bf, gt_bf))
    ref5 = _ref_neg_loss(pred_bf, gt_bf)
    assert jnp.allclose(out5, ref5, rtol=1e-3, atol=1e-3), (out5, ref5)

    print("KERNEL_OK")
</pallas_src>

<mosaic_0001>
module attributes {stable_mosaic.version = 11 : i64} {
  func.func @_focal_kernel(%arg0: i32, %arg1: i32, %arg2: memref<4x512xf32, #tpu.memory_space<vmem>>, %arg3: memref<4x512xf32, #tpu.memory_space<vmem>>, %arg4: memref<1x1x1xf32, #tpu.memory_space<vmem>>, %arg5: memref<1x1x1xf32, #tpu.memory_space<vmem>>, %arg6: memref<4x512xf32, #tpu.memory_space<vmem>>, %arg7: memref<4x512xf32, #tpu.memory_space<vmem>>) attributes {dimension_semantics = [#tpu.dimension_semantics<parallel>, #tpu.dimension_semantics<arbitrary>], iteration_bounds = array<i64: 1, 1>, scalar_prefetch = 0 : i64, scratch_operands = 2 : i64, tpu.core_type = #tpu.core_type<tc>, window_params = [{transform_indices = @transform_0, window_bounds = array<i64: 4, 512>}, {transform_indices = @transform_1, window_bounds = array<i64: 4, 512>}, {transform_indices = @transform_2, window_bounds = array<i64: 1, 1, 1>}, {transform_indices = @transform_3, window_bounds = array<i64: 1, 1, 1>}]} {
    %c0_i32 = arith.constant 0 : i32
    %0 = arith.cmpi eq, %arg1, %c0_i32 : i32
    %1 = arith.extui %0 : i1 to i32
    %c0_i32_0 = arith.constant 0 : i32
    %2 = arith.cmpi ne, %1, %c0_i32_0 : i32
    scf.if %2 {
      %cst_18 = arith.constant 0.000000e+00 : f32
      %35 = vector.broadcast %cst_18 : f32 to vector<4x512xf32>
      %c0_19 = arith.constant 0 : index
      %c0_20 = arith.constant 0 : index
      %36 = vector.load %arg6[%c0_19, %c0_20] : memref<4x512xf32, #tpu.memory_space<vmem>>, vector<4x512xf32>
      tpu.vector_store %arg6[%c0_19, %c0_20], %35 {strides = array<i32>} : memref<4x512xf32, #tpu.memory_space<vmem>>, vector<4x512xf32>,
      %cst_21 = arith.constant 0.000000e+00 : f32
      %37 = vector.broadcast %cst_21 : f32 to vector<4x512xf32>
      %c0_22 = arith.constant 0 : index
      %c0_23 = arith.constant 0 : index
      %38 = vector.load %arg7[%c0_22, %c0_23] : memref<4x512xf32, #tpu.memory_space<vmem>>, vector<4x512xf32>
      tpu.vector_store %arg7[%c0_22, %c0_23], %37 {strides = array<i32>} : memref<4x512xf32, #tpu.memory_space<vmem>>, vector<4x512xf32>,
    } else {
    }
    %c0 = arith.constant 0 : index
    %c0_1 = arith.constant 0 : index
    %3 = vector.load %arg2[%c0, %c0_1] : memref<4x512xf32, #tpu.memory_space<vmem>>, vector<4x512xf32>
    %c0_2 = arith.constant 0 : index
    %c0_3 = arith.constant 0 : index
    %4 = vector.load %arg3[%c0_2, %c0_3] : memref<4x512xf32, #tpu.memory_space<vmem>>, vector<4x512xf32>
    %cst = arith.constant 1.000000e+00 : f32
    %5 = vector.broadcast %cst : f32 to vector<4x512xf32>
    %6 = arith.cmpf oeq, %4, %5 : vector<4x512xf32>
    %cst_4 = arith.constant 1.000000e+00 : f32
    %7 = vector.broadcast %cst_4 : f32 to vector<4x512xf32>
    %8 = arith.cmpf olt, %4, %7 : vector<4x512xf32>
    %cst_5 = arith.constant 1.000000e+00 : f32
    %9 = vector.broadcast %cst_5 : f32 to vector<4x512xf32>
    %10 = arith.subf %9, %3 : vector<4x512xf32>
    %cst_6 = arith.constant 1.000000e+00 : f32
    %11 = vector.broadcast %cst_6 : f32 to vector<4x512xf32>
    %12 = arith.subf %11, %4 : vector<4x512xf32>
    %13 = arith.mulf %12, %12 : vector<4x512xf32>
    %14 = arith.mulf %13, %13 : vector<4x512xf32>
    %15 = arith.select %6, %3, %10 : vector<4x512xi1>, vector<4x512xf32>
    %16 = math.log %15 : vector<4x512xf32>
    %17 = arith.mulf %10, %10 : vector<4x512xf32>
    %18 = arith.mulf %3, %3 : vector<4x512xf32>
    %19 = arith.mulf %18, %14 : vector<4x512xf32>
    %cst_7 = arith.constant 0.000000e+00 : f32
    %20 = vector.broadcast %cst_7 : f32 to vector<4x512xf32>
    %21 = arith.select %8, %19, %20 : vector<4x512xi1>, vector<4x512xf32>
    %22 = arith.select %6, %17, %21 : vector<4x512xi1>, vector<4x512xf32>
    %23 = arith.mulf %16, %22 : vector<4x512xf32>
    %24 = arith.extui %6 : vector<4x512xi1> to vector<4x512xi32>
    %25 = arith.sitofp %24 : vector<4x512xi32> to vector<4x512xf32>
    %c0_8 = arith.constant 0 : index
    %c0_9 = arith.constant 0 : index
    %26 = vector.load %arg6[%c0_8, %c0_9] : memref<4x512xf32, #tpu.memory_space<vmem>>, vector<4x512xf32>
    %27 = arith.addf %26, %23 : vector<4x512xf32>
    %c0_10 = arith.constant 0 : index
    %c0_11 = arith.constant 0 : index
    %28 = vector.load %arg6[%c0_10, %c0_11] : memref<4x512xf32, #tpu.memory_space<vmem>>, vector<4x512xf32>
    tpu.vector_store %arg6[%c0_10, %c0_11], %27 {strides = array<i32>} : memref<4x512xf32, #tpu.memory_space<vmem>>, vector<4x512xf32>,
    %c0_12 = arith.constant 0 : index
    %c0_13 = arith.constant 0 : index
    %29 = vector.load %arg7[%c0_12, %c0_13] : memref<4x512xf32, #tpu.memory_space<vmem>>, vector<4x512xf32>
    %30 = arith.addf %29, %25 : vector<4x512xf32>
    %c0_14 = arith.constant 0 : index
    %c0_15 = arith.constant 0 : index
    %31 = vector.load %arg7[%c0_14, %c0_15] : memref<4x512xf32, #tpu.memory_space<vmem>>, vector<4x512xf32>
    tpu.vector_store %arg7[%c0_14, %c0_15], %30 {strides = array<i32>} : memref<4x512xf32, #tpu.memory_space<vmem>>, vector<4x512xf32>,
    %c0_i32_16 = arith.constant 0 : i32
    %32 = arith.cmpi eq, %arg1, %c0_i32_16 : i32
    %33 = arith.extui %32 : i1 to i32
    %c0_i32_17 = arith.constant 0 : i32
    %34 = arith.cmpi ne, %33, %c0_i32_17 : i32
    scf.if %34 {
      %c0_18 = arith.constant 0 : index
      %c0_19 = arith.constant 0 : index
      %35 = vector.load %arg6[%c0_18, %c0_19] : memref<4x512xf32, #tpu.memory_space<vmem>>, vector<4x512xf32>
      %36 = vector.shape_cast %35 : vector<4x512xf32> to vector<1x4x512xf32>
      %cst_20 = arith.constant dense<0.000000e+00> : vector<1xf32>
      %37 = vector.multi_reduction <add>, %36, %cst_20 [1, 2] : vector<1x4x512xf32> to vector<1xf32>
      %38 = vector.shape_cast %37 : vector<1xf32> to vector<1x1x1xf32>
      %39 = vector.extract %38[0, 0, 0] : f32 from vector<1x1x1xf32>
      %40 = vector.broadcast %39 : f32 to vector<1x1x1xf32>
      %c0_21 = arith.constant 0 : index
      %c0_22 = arith.constant 0 : index
      %c0_23 = arith.constant 0 : index
      %41 = vector.load %arg4[%c0_21, %c0_22, %c0_23] : memref<1x1x1xf32, #tpu.memory_space<vmem>>, vector<1x1x1xf32>
      tpu.vector_store %arg4[%c0_21, %c0_22, %c0_23], %40 {strides = array<i32>} : memref<1x1x1xf32, #tpu.memory_space<vmem>>, vector<1x1x1xf32>,
      %c0_24 = arith.constant 0 : index
      %c0_25 = arith.constant 0 : index
      %42 = vector.load %arg7[%c0_24, %c0_25] : memref<4x512xf32, #tpu.memory_space<vmem>>, vector<4x512xf32>
      %43 = vector.shape_cast %42 : vector<4x512xf32> to vector<1x4x512xf32>
      %cst_26 = arith.constant dense<0.000000e+00> : vector<1xf32>
      %44 = vector.multi_reduction <add>, %43, %cst_26 [1, 2] : vector<1x4x512xf32> to vector<1xf32>
      %45 = vector.shape_cast %44 : vector<1xf32> to vector<1x1x1xf32>
      %46 = vector.extract %45[0, 0, 0] : f32 from vector<1x1x1xf32>
      %47 = vector.broadcast %46 : f32 to vector<1x1x1xf32>
      %c0_27 = arith.constant 0 : index
      %c0_28 = arith.constant 0 : index
      %c0_29 = arith.constant 0 : index
      %48 = vector.load %arg5[%c0_27, %c0_28, %c0_29] : memref<1x1x1xf32, #tpu.memory_space<vmem>>, vector<1x1x1xf32>
      tpu.vector_store %arg5[%c0_27, %c0_28, %c0_29], %47 {strides = array<i32>} : memref<1x1x1xf32, #tpu.memory_space<vmem>>, vector<1x1x1xf32>,
    } else {
    }
    return
  }
  func.func @transform_0(%arg0: i32, %arg1: i32) -> (i32, i32) {
    %c1_i32 = arith.constant 1 : i32
    %0 = arith.muli %arg0, %c1_i32 : i32
    %1 = arith.addi %0, %arg1 : i32
    %c0_i32 = arith.constant 0 : i32
    %c0_i32_0 = arith.constant 0 : i32
    return %1, %c0_i32 : i32, i32
  }
  func.func @transform_1(%arg0: i32, %arg1: i32) -> (i32, i32) {
    %c1_i32 = arith.constant 1 : i32
    %0 = arith.muli %arg0, %c1_i32 : i32
    %1 = arith.addi %0, %arg1 : i32
    %c0_i32 = arith.constant 0 : i32
    %c0_i32_0 = arith.constant 0 : i32
    return %1, %c0_i32 : i32, i32
  }
  func.func @transform_2(%arg0: i32, %arg1: i32) -> (i32, i32, i32) {
    %c0_i32 = arith.constant 0 : i32
    %c0_i32_0 = arith.constant 0 : i32
    %c0_i32_1 = arith.constant 0 : i32
    return %arg0, %c0_i32, %c0_i32_0 : i32, i32, i32
  }
  func.func @transform_3(%arg0: i32, %arg1: i32) -> (i32, i32, i32) {
    %c0_i32 = arith.constant 0 : i32
    %c0_i32_0 = arith.constant 0 : i32
    %c0_i32_1 = arith.constant 0 : i32
    return %arg0, %c0_i32, %c0_i32_0 : i32, i32, i32
  }
}

</mosaic_0001>

<bundles_post_ra>
// kernel: tpu_custom_call.1
= control target key start
LH: loop header
LB: loop body
LE: loop exit
PB: predicated region body
PF: predicated region fallthrough
CT: control target
= control target key end

     0   :  { %9 = vsyncpa [#allocation5], 0  ;;  %s350_s0 = inlined_call_operand.hbm [shape: f32[4,512], index: 0, kind: input, shape index: {}]   ;;  %s351_s1 = inlined_call_operand.hbm [shape: f32[4,512], index: 1, kind: input, shape index: {}]   ;;  %s352_s2 = inlined_call_operand.hbm [shape: f32[1,1,1], index: 2, kind: output, shape index: {0}]   ;;  %s353_s3 = inlined_call_operand.hbm [shape: f32[1,1,1], index: 3, kind: output, shape index: {1}]  }
   0x1   :  { %10 = vsyncpa [#allocation8], 0 }
   0x2   :  { %11 = vsyncpa [#allocation6], 0 }
   0x3   :  { %12 = vsyncpa [#allocation11], 0  ;;  %s297_s12 = smov [#allocation4]   ;;  %s298_s14 = smov [#allocation7]  }
   0x4   :  { %s23_s13 = sshll.u32 %s297_s12, 4  ;;  %s37_s15 = sshll.u32 %s298_s14, 4  ;;  %s24_s13 = int_to_ptr.vmem [resolvable:$true] %s23_s13  ;;  %s38_s15 = int_to_ptr.vmem [resolvable:$true] %s37_s15 }
   0x5   :  { %s217_s16 = scalar_lea.vmem %s24_s13, 256  ;;  %p222_p1 = scmp.lt.s32.totalorder %s24_s13, %s24_s13 }
   0x6   :  { %p218_p0 = scmp.ne.s32.totalorder %s24_s13, %s217_s16  ;;  %p223_p2 = scmp.lt.s32.totalorder %s217_s16, %s217_s16 }
   0x8   :  { %p224_p3 = por %p223_p2, %p222_p1 }
   0xa   :  { %p225_p4 = pnand %p224_p3, %p218_p0 }
   0xc   :  { %228 = shalt.err (!%p225_p4)
}
   0xd   :  { %26 = dma.hbm_to_vmem [thread:$0]  %s350_s0, 256, %s24_s13, [#allocation5]  }
   0xe   :  { %s237_s19 = scalar_lea.vmem %s38_s15, 256  ;;  %p242_p6 = scmp.lt.s32.totalorder %s38_s15, %s38_s15 }
   0xf   :  { %p238_p5 = scmp.ne.s32.totalorder %s38_s15, %s237_s19  ;;  %p243_p7 = scmp.lt.s32.totalorder %s237_s19, %s237_s19 }
  0x11   :  { %p244_p8 = por %p243_p7, %p242_p6 }
  0x13   :  { %p245_p9 = pnand %p244_p8, %p238_p5 }
  0x15   :  { %248 = shalt.err (!%p245_p9)
}
  0x16   :  { %40 = dma.hbm_to_vmem [thread:$0]  %s351_s1, 256, %s38_s15, [#allocation8]  }
  0x17   :  { %289 = dma.done.wait [#allocation5], 256  }
  0x18   :  { %290 = vsyncadd [#allocation5], 4294967040 }
  0x19   :  { %291 = dma.done.wait [#allocation8], 256  }
  0x1a   :  { %292 = vsyncadd [#allocation8], 4294967040  ;;  %v57_v0 = vld [vmem:[#allocation4] sm:$0xff]  ;;  %v58_v1 = vld [vmem:[#allocation4 + $0x8] sm:$0xff]  ;;  %v299_v19 = vmov 0.0   ;;  %vm118_vm4 = vcmask 1043456  }
  0x1b   :  { %v59_v2 = vld [vmem:[#allocation7] sm:$0xff]  ;;  %v60_v3 = vld [vmem:[#allocation7 + $0x8] sm:$0xff]  ;;  %v65_v4 = vsub.f32 1.0, %v57_v0  ;;  %v66_v5 = vsub.f32 1.0, %v58_v1  ;;  %v81_v13 = vmul.f32 %v57_v0, %v57_v0  ;;  %v82_v15 = vmul.f32 %v58_v1, %v58_v1  ;;  %s300_s0 = smov [#allocation9]   ;;  %s301_s23 = smov [#allocation10]  }
  0x1c   :  { %vm61_vm0 = vcmp.eq.f32.partialorder %v59_v2, 1.0  ;;  %vm62_vm1 = vcmp.eq.f32.partialorder %v60_v3, 1.0  ;;  %v67_v6 = vsub.f32 1.0, %v59_v2  ;;  %v68_v7 = vsub.f32 1.0, %v60_v3  ;;  %s170_s1 = sshll.u32 %s300_s0, 4  ;;  %s180_s24 = sshll.u32 %s301_s23, 4  ;;  %s171_s1 = int_to_ptr.vmem [resolvable:$true] %s170_s1  ;;  %s181_s24 = int_to_ptr.vmem [resolvable:$true] %s180_s24 }
  0x1d   :  { %v73_v8 = vsel %vm61_vm0, %v57_v0, %v65_v4  ;;  %v74_v9 = vsel %vm62_vm1, %v58_v1, %v66_v5  ;;  %vm63_vm2 = vcmp.lt.f32.partialorder %v59_v2, 1.0  ;;  %vm64_vm3 = vcmp.lt.f32.partialorder %v60_v3, 1.0  ;;  %s249_s25 = scalar_lea.vmem %s171_s1, 16  ;;  %s253_s26 = scalar_lea.vmem %s171_s1, 32 }
  0x1e   :  { %v69_v10 = vmul.f32 %v67_v6, %v67_v6  ;;  %v70_v11 = vmul.f32 %v68_v7, %v68_v7  ;;  %205 = vlog2.f32 %v73_v8  ;;  %v79_v18 = vmul.f32 %v65_v4, %v65_v4  ;;  %p250_p10 = scmp.ne.s32.totalorder %s171_s1, %s249_s25  ;;  %p254_p11 = scmp.lt.s32.totalorder %s171_s1, %s171_s1 }
  0x1f   :  { %207 = vlog2.f32 %v74_v9  ;;  %v194_v20 = vsel %vm61_vm0, 1.0, %v299_v19  ;;  %v80_v21 = vmul.f32 %v66_v5, %v66_v5  ;;  %v195_v35 = vsel %vm62_vm1, 1.0, %v299_v19  ;;  %p255_p12 = scmp.lt.s32.totalorder %s253_s26, %s249_s25 }
  0x20   :  { %v71_v12 = vmul.f32 %v69_v10, %v69_v10  ;;  %v72_v14 = vmul.f32 %v70_v11, %v70_v11  ;;  %v142_v24 = vcombine.high %v194_v20, %v194_v20  ;;  %v146_v32 = vsel %vm118_vm4, %v194_v20, 0.0 }
  0x21   :  { %v143_v42 = vcombine.high %v195_v35, %v195_v35  ;;  %v149_v43 = vsel %vm118_vm4, %v195_v35, 0.0  ;;  %vm136_vm5 = vcmask 0   ;;  %p256_p13 = por %p255_p12, %p254_p11 }
  0x22   :  { %v83_v16 = vmul.f32 %v81_v13, %v71_v12  ;;  %v84_v17 = vmul.f32 %v82_v15, %v72_v14  ;;  %v147_v33 = vsel %vm118_vm4, %v142_v24, 0.0 }
  0x23   :  { %v148_v39 = vadd.f32 %v147_v33, %v146_v32  ;;  %v151_v48 = vsel %vm118_vm4, %v143_v42, 0.0  ;;  %p257_p0 = pnand %p256_p13, %p250_p10 }
  0x24   :  { %v85_v22 = vsel %vm63_vm2, %v83_v16, 0.0  ;;  %v86_v23 = vsel %vm64_vm3, %v84_v17, 0.0 }
  0x25   :  { %v87_v26 = vsel %vm61_vm0, %v79_v18, %v85_v22  ;;  %v88_v29 = vsel %vm62_vm1, %v80_v21, %v86_v23  ;;  %v150_v47 = vadd.f32 %v149_v43, %v148_v39 }
  0x27   :  { %v152_v50 = vadd.f32 %v151_v48, %v150_v47 }
  0x2b   :  { %v206_v25 = vpop.eup %205 }
  0x2c   :  { %v208_v27 = vpop.eup %207  ;;  %v76_v28 = vmul.f32 0.6931472, %v206_v25 }
  0x2d   :  { %v78_v30 = vmul.f32 0.6931472, %v208_v27 }
  0x2e   :  { %v89_v31 = vmul.f32 %v87_v26, %v76_v28 }
  0x2f   :  { %v90_v34 = vmul.f32 %v88_v29, %v78_v30 }
  0x30   :  { %v114_v36 = vcombine.high %v89_v31, %v89_v31  ;;  %v119_v37 = vsel %vm118_vm4, %v89_v31, 0.0 }
  0x31   :  { %v115_v38 = vcombine.high %v90_v34, %v90_v34  ;;  %v122_v41 = vsel %vm118_vm4, %v90_v34, 0.0 }
  0x32   :  { %v120_v40 = vsel %vm118_vm4, %v114_v36, 0.0 }
  0x33   :  { %v121_v44 = vadd.f32 %v120_v40, %v119_v37  ;;  %v124_v45 = vsel %vm118_vm4, %v115_v38, 0.0 }
  0x35   :  { %v123_v46 = vadd.f32 %v122_v41, %v121_v44 }
  0x37   :  { %v125_v49 = vadd.f32 %v124_v45, %v123_v46 }
  0x39   :  { %126 = vadd.xlane.f32.xlu0 %v125_v49 }
  0x3d   :  { %153 = vadd.xlane.f32.xlu0 %v152_v50 }
  0xc2   :  { %v127_v51 = vpop.xlane.xlu0 %126 }
  0xc3   :  { %v128_v52 = vrot.slane %v127_v51, 4 }
  0xc5   :  { %v129_v53 = vadd.f32 %v128_v52, %v127_v51 }
  0xc6   :  { %v154_v54 = vpop.xlane.xlu0 %153 }
  0xc7   :  { %v130_v55 = vrot.slane %v129_v53, 2  ;;  %v155_v56 = vrot.slane %v154_v54, 4 }
  0xc9   :  { %v156_v57 = vadd.f32 %v155_v56, %v154_v54  ;;  %v131_v58 = vadd.f32 %v130_v55, %v129_v53 }
  0xcb   :  { %v157_v59 = vrot.slane %v156_v57, 2  ;;  %v132_v60 = vrot.slane %v131_v58, 1 }
  0xcd   :  { %v158_v61 = vadd.f32 %v157_v59, %v156_v57  ;;  %v133_v62 = vadd.f32 %v132_v60, %v131_v58 }
  0xcf   :  { %196 = vpush %v133_v62  ;;  %v159_v63 = vrot.slane %v158_v61, 1 }
  0xd1   :  { %v160_v0 = vadd.f32 %v159_v63, %v158_v61 }
  0xd3   :  { %198 = vpush %v160_v0 }
 0x100   :  { %s197_s22 = spop %196 }
 0x101   :  { %v135_v1 = vstv %s197_s22 }
 0x102   :  { %137 = vst.msk [vmem:[#allocation9] sm:$0x1] %vm136_vm5, %v135_v1 }
 0x103   :  { %260 = shalt.err (!%p257_p0)
}
 0x104   :  { %173 = dma.vmem_to_hbm [thread:$0]  %s171_s1, 16, %s352_s2, [#allocation6]  }
 0x105   :  { %s199_s29 = spop %198  ;;  %s269_s30 = scalar_lea.vmem %s181_s24, 16 }
 0x106   :  { %v162_v2 = vstv %s199_s29  ;;  %p270_p1 = scmp.ne.s32.totalorder %s181_s24, %s269_s30  ;;  %s273_s4 = scalar_lea.vmem %s181_s24, 32 }
 0x107   :  { %163 = vst.msk [vmem:[#allocation10] sm:$0x1] %vm136_vm5, %v162_v2  ;;  %p274_p2 = scmp.lt.s32.totalorder %s181_s24, %s181_s24  ;;  %p275_p3 = scmp.lt.s32.totalorder %s273_s4, %s269_s30 }
 0x109   :  { %p276_p4 = por %p275_p3, %p274_p2 }
 0x10b   :  { %p277_p5 = pnand %p276_p4, %p270_p1 }
 0x10d   :  { %280 = shalt.err (!%p277_p5)
}
 0x10e   :  { %183 = dma.vmem_to_hbm [thread:$0]  %s181_s24, 16, %s353_s3, [#allocation11]  }
 0x10f   :  { %293 = dma.done.wait [#allocation6], 16  }
 0x110   :  { %294 = vsyncadd [#allocation6], 4294967280 }
 0x111   :  { %295 = dma.done.wait [#allocation11], 16  }
 0x112   :  { %296 = vsyncadd [#allocation11], 4294967280 }
 0x113   :  { %190 = vsyncpa [#allocation5], 1 }
 0x114   :  { %191 = vsyncpa [#allocation8], 1 }
 0x115   :  { %192 = vsyncpa [#allocation6], 1 }
 0x116   :  { %193 = vsyncpa [#allocation11], 1 }

</bundles_post_ra>
